<compile_context>
chip_gen: v7x
topology: tpu7x:2x2x1
jax: 0.10.0
libtpu: 0.0.40
codegen_flags: <defaults>
</compile_context>

<pallas_src>
import jax
import jax.numpy as jnp
from jax import lax
from jax.experimental import pallas as pl
from jax.experimental.pallas import tpu as pltpu


def _round_up(x, m):
    return (x + m - 1) // m * m


def _device_params():
    """Generation-aware tiling / VMEM budgets (conservative when unknown)."""
    kind = ""
    try:
        kind = jax.devices()[0].device_kind.lower()
    except Exception:
        pass
    is_v7 = "v7" in kind
    is_v5e = ("v5e" in kind) or ("v5 lite" in kind) or ("v5lite" in kind)
    # v4/v5/v6 have 128 MiB VMEM; v7x only 64 MiB.  Unknown -> conservative.
    big_vmem = (not is_v7) and any(v in kind for v in ("v4", "v5", "v6"))
    return {
        "is_v7x": is_v7,
        "vmem_limit": (96 if big_vmem else 48) * 1024 * 1024,
        "table_budget": (24 if big_vmem else 8) * 1024 * 1024,
        "f_tile_cap": 2048 if big_vmem else 512,
        "mxu_m": 128 if is_v5e else 256,
    }


# --------------------------------------------------------------------------
# Path 1: table-streaming counts @ table kernel
# --------------------------------------------------------------------------
def _make_stream_kernel(seq_len, f_total, f_tile, mm_dtype, n_chunks,
                        use_static_chunks):
    inv_s = 1.0 / float(seq_len)
    mask_last = (f_total % f_tile) != 0   # ragged last F tile -> mask garbage rows

    def kernel(x_ref, t_ref, o_ref, acc_ref):
        f_idx = pl.program_id(1)

        @pl.when(f_idx == 0)
        def _init():
            acc_ref[...] = jnp.zeros_like(acc_ref)

        b_t = x_ref.shape[0]
        x = x_ref[...]                                       # (B_t, S_pad) int32
        lo = f_idx * f_tile

        # Empty-tile skip: a batch tile touches at most B_t*S distinct rows, so
        # for large vocabularies most (b, f) grid cells have zero hits and both
        # the O(B*S*F_tile) one-hot build and the matmul can be skipped.
        in_range = (x >= lo) & (x < lo + f_tile)
        has_hit = jnp.max(in_range.astype(jnp.int32)) > 0

        @pl.when(has_hit)
        def _compute():
            f_ids = lo + lax.broadcasted_iota(jnp.int32, (1, 1, f_tile), 2)

            def chunk_counts(xs):                            # xs: (B_t, 8) int32
                hits = (xs[:, :, None] == f_ids).astype(jnp.int32)
                return jnp.sum(hits, axis=1)                 # (B_t, f_tile)

            if use_static_chunks:
                counts = jnp.zeros((b_t, f_tile), jnp.int32)
                for c in range(n_chunks):                    # static unroll
                    counts = counts + chunk_counts(x[:, c * 8:(c + 1) * 8])
            else:
                # TODO(synk): dynamic minor-dim slices for very long sequences;
                # gate any counts-loop restructure on a bundle dump (XLU vs VALU).
                def body(c, counts):
                    start = pl.multiple_of(c * 8, 8)
                    return counts + chunk_counts(x_ref[:, pl.ds(start, 8)])
                counts = lax.fori_loop(0, n_chunks, body,
                                       jnp.zeros((b_t, f_tile), jnp.int32),
                                       unroll=min(n_chunks, 8))

            tbl = t_ref[...].astype(mm_dtype)
            if mask_last:
                # Last F tile overhangs the (unpadded) table: zero garbage rows.
                rows = lo + lax.broadcasted_iota(jnp.int32, (f_tile, 1), 0)
                tbl = jnp.where(rows < f_total, tbl, jnp.zeros_like(tbl))

            acc_ref[...] += jnp.dot(counts.astype(mm_dtype), tbl,
                                    preferred_element_type=jnp.float32)

        @pl.when(f_idx == pl.num_programs(1) - 1)
        def _finalize():
            o_ref[...] = (acc_ref[...] * inv_s).astype(o_ref.dtype)

    return kernel


def _embedding_mean_stream(X, table, *, f_tile=None):
    B, S = X.shape
    F, E = table.shape
    out_dtype = table.dtype
    itemsize = jnp.dtype(table.dtype).itemsize
    p = _device_params()

    # ---- E handling: avoid full-table pad copies (only pad E when needed) ----
    if E % 128 == 0:
        E_blk, table_in = E, table
    elif F * E * itemsize <= 64 * 1024 * 1024:
        E_blk = _round_up(E, 128)                       # lane-dense tiles/stores
        table_in = jnp.pad(table, ((0, 0), (0, E_blk - E)))
    else:
        E_blk, table_in = E, table                      # huge table: skip the copy
    E_vm = _round_up(E_blk, 128)

    # ---- batch tiling (MXU-M aware; v7x megacore split for small batches) ----
    if B > 128:
        B_TILE = 256 if (B >= 256 and p["mxu_m"] >= 256) else 128
    else:
        B_TILE = _round_up(B, 8)
        if p["is_v7x"] and B >= 16:
            B_TILE = _round_up(pl.cdiv(B, 2), 8)        # 2 parallel tiles -> 2 TCs
    B_pad = _round_up(B, B_TILE)

    S_pad = _round_up(S, 8)

    # ---- feature tiling: never pad F; ragged last tile is masked in-kernel ----
    if f_tile is not None:
        F_TILE = min(int(f_tile), F)
    else:
        budget_rows = max(8, p["table_budget"] // (2 * E_vm * itemsize))
        F_TILE = min(p["f_tile_cap"], budget_rows, F)
    if F_TILE < F:
        F_TILE = max(8, F_TILE // 8 * 8)

    def vmem_bytes(bt, ft):
        acc = bt * E_vm * 4
        out = 2 * bt * E_vm * 4
        xin = 2 * bt * _round_up(S_pad, 128) * 4
        tab = 2 * ft * E_vm * itemsize
        return acc + out + xin + tab

    while vmem_bytes(B_TILE, F_TILE) > p["vmem_limit"] * 3 // 4 and F_TILE > 8:
        F_TILE = max(8, F_TILE // 2 // 8 * 8)
    while vmem_bytes(B_TILE, F_TILE) > p["vmem_limit"] * 3 // 4 and B_TILE > 8:
        B_TILE = max(8, B_TILE // 2 // 8 * 8)
        B_pad = _round_up(B, B_TILE)

    # ---- pad indices only (cheap): -1 never matches a valid feature id ----
    Xp = jnp.full((B_pad, S_pad), -1, dtype=jnp.int32)
    Xp = Xp.at[:B, :S].set(X.astype(jnp.int32))

    # bf16 MXU path only when counts are exactly representable in bf16.
    mm_dtype = jnp.bfloat16 if (table.dtype == jnp.bfloat16 and S <= 256) else jnp.float32

    n_chunks = S_pad // 8
    use_static = n_chunks <= 64
    kernel = _make_stream_kernel(S, F, F_TILE, mm_dtype, n_chunks, use_static)

    grid = (B_pad // B_TILE, pl.cdiv(F, F_TILE))
    out_p = pl.pallas_call(
        kernel,
        out_shape=jax.ShapeDtypeStruct((B_pad, E_blk), out_dtype),
        grid_spec=pltpu.PrefetchScalarGridSpec(
            num_scalar_prefetch=0,
            grid=grid,
            in_specs=[
                pl.BlockSpec((B_TILE, S_pad), lambda b, f: (b, 0)),   # indices
                pl.BlockSpec((F_TILE, E_blk), lambda b, f: (f, 0)),   # table tile
            ],
            out_specs=pl.BlockSpec((B_TILE, E_blk), lambda b, f: (b, 0)),
            scratch_shapes=[pltpu.VMEM((B_TILE, E_blk), jnp.float32)],
        ),
        compiler_params=pltpu.CompilerParams(
            dimension_semantics=("parallel", "arbitrary"),
            vmem_limit_bytes=p["vmem_limit"],
        ),
    )(Xp, table_in)

    return out_p[:B, :E]


# --------------------------------------------------------------------------
# Path 2: scalar-prefetch + manual-DMA row gather (large vocab, few lookups)
# --------------------------------------------------------------------------
def _make_gather_kernel(seq_len, b_tile, emb):
    inv_s = 1.0 / float(seq_len)

    def kernel(idx_ref, t_hbm, o_ref, rowbuf, sem):
        b_idx = pl.program_id(0)

        @pl.loop(0, b_tile)
        def _row(r):
            base = (b_idx * b_tile + r) * seq_len

            def fetch(s, slot):
                i = idx_ref[base + s]
                pltpu.make_async_copy(
                    t_hbm.at[pl.ds(i, 1), :], rowbuf.at[slot], sem.at[slot]
                ).start()

            fetch(0, 0)                                   # prime slot 0

            def body(s, acc):
                slot = s & 1
                pltpu.make_async_copy(
                    t_hbm.at[pl.ds(0, 1), :], rowbuf.at[slot], sem.at[slot]
                ).wait()

                @pl.when(s + 1 < seq_len)
                def _():
                    fetch(s + 1, 1 - slot)                # prefetch next row

                return acc + rowbuf[slot].astype(jnp.float32)

            acc = lax.fori_loop(0, seq_len, body,
                                jnp.zeros((1, emb), jnp.float32))
            o_ref[pl.ds(r, 1), :] = (acc * inv_s).astype(o_ref.dtype)

    return kernel


def _embedding_mean_gather(X, table):
    B, S = X.shape
    F, E = table.shape
    p = _device_params()

    B_TILE = min(_round_up(B, 8), 128)
    if p["is_v7x"] and B <= 128 and B >= 16:
        B_TILE = _round_up(pl.cdiv(B, 2), 8)              # keep both TCs busy
    B_pad = _round_up(B, B_TILE)

    # Padded batch rows gather row 0 (harmless; sliced off below).
    idx = jnp.zeros((B_pad, S), jnp.int32).at[:B, :].set(X.astype(jnp.int32))
    idx_flat = idx.reshape(-1)

    kernel = _make_gather_kernel(S, B_TILE, E)
    out_p = pl.pallas_call(
        kernel,
        out_shape=jax.ShapeDtypeStruct((B_pad, E), table.dtype),
        grid_spec=pltpu.PrefetchScalarGridSpec(
            num_scalar_prefetch=1,                         # indices -> SMEM
            grid=(B_pad // B_TILE,),
            in_specs=[pl.BlockSpec(memory_space=pl.ANY)],  # table stays in HBM
            out_specs=pl.BlockSpec((B_TILE, E), lambda b, idx: (b, 0)),
            scratch_shapes=[
                pltpu.VMEM((2, 1, E), table.dtype),        # double-buffered row
                pltpu.SemaphoreType.DMA((2,)),
            ],
        ),
        compiler_params=pltpu.CompilerParams(
            dimension_semantics=("parallel",),
            vmem_limit_bytes=p["vmem_limit"],
        ),
    )(idx_flat, table)

    return out_p[:B, :]


# --------------------------------------------------------------------------
# Public wrapper (EmbeddingUnitLayer.forward)
# --------------------------------------------------------------------------
def embedding_unit_layer(X, table, meaning=True, *, force_path=None, f_tile=None):
    """Pallas TPU implementation of EmbeddingUnitLayer.forward."""
    if not meaning:
        # TODO(synk): meaning=False path (raw (B, S, E) gather) kept in plain JAX.
        return jnp.take(table, X, axis=0)

    B, S = X.shape
    F, E = table.shape
    itemsize = jnp.dtype(table.dtype).itemsize

    if force_path is None:
        # Per-call cost model: streaming re-reads the whole table once per batch
        # tile; gathering does one small row DMA (~2 KiB floor) per (b, s) lookup.
        n_bt = pl.cdiv(B, min(_round_up(B, 8), 128))
        stream_cost = n_bt * F * max(E, 128) * itemsize
        gather_cost = _round_up(B, 8) * S * max(E * itemsize, 2048)
        use_gather = gather_cost * 4 < stream_cost
    else:
        use_gather = (force_path == "gather")

    if use_gather:
        return _embedding_mean_gather(X, table)
    return _embedding_mean_stream(X, table, f_tile=f_tile)


if __name__ == "__main__":
    key = jax.random.PRNGKey(0)
    k_w, k_x, k_w2, k_x2 = jax.random.split(key, 4)

    # Case 1: module-sized demo (features=32, embedding=16, batch=4, seq=8).
    F1, E1, B1, S1 = 32, 16, 4, 8
    table1 = jax.random.normal(k_w, (F1, E1), dtype=jnp.float32) * 1e-4
    X1 = jax.random.randint(k_x, (B1, S1), 0, F1, dtype=jnp.int32)
    ref1 = jnp.mean(jnp.take(table1, X1, axis=0), axis=1)

    out1 = jax.block_until_ready(embedding_unit_layer(X1, table1))
    assert out1.shape == (B1, E1)
    assert jnp.allclose(out1, ref1, atol=1e-6, rtol=1e-4), "stream path mismatch"

    # Case 2: streaming path with multiple F tiles, a ragged last tile (masked
    # in-kernel) and an untouched middle tile (exercises the empty-tile skip).
    F2, E2, B2, S2 = 40, 16, 20, 12
    table2 = jax.random.normal(k_w2, (F2, E2), dtype=jnp.float32) * 1e-4
    X2 = jax.random.randint(k_x2, (B2, S2), 0, 16, dtype=jnp.int32)
    X2 = X2.at[0, 0].set(39)          # one hit in the ragged last tile
    ref2 = jnp.mean(jnp.take(table2, X2, axis=0), axis=1)
    out2 = jax.block_until_ready(
        embedding_unit_layer(X2, table2, force_path="stream", f_tile=16))
    assert jnp.allclose(out2, ref2, atol=1e-6, rtol=1e-4), "ragged/skip mismatch"

    # Case 3: manual-DMA gather path (large-vocab / few-lookups regime).
    out3 = jax.block_until_ready(
        embedding_unit_layer(X1, table1, force_path="gather"))
    assert jnp.allclose(out3, ref1, atol=1e-6, rtol=1e-4), "gather path mismatch"

    print("KERNEL_OK")
</pallas_src>

<mosaic_0001>
module attributes {stable_mosaic.version = 11 : i64} {
  func.func @kernel(%arg0: i32, %arg1: i32, %arg2: memref<8x8xi32, #tpu.memory_space<vmem>>, %arg3: memref<32x128xf32, #tpu.memory_space<vmem>>, %arg4: memref<8x128xf32, #tpu.memory_space<vmem>>, %arg5: memref<8x128xf32, #tpu.memory_space<vmem>>) attributes {dimension_semantics = [#tpu.dimension_semantics<parallel>, #tpu.dimension_semantics<arbitrary>], iteration_bounds = array<i64: 1, 1>, scalar_prefetch = 0 : i64, scratch_operands = 1 : i64, tpu.core_type = #tpu.core_type<tc>, window_params = [{transform_indices = @transform_0, window_bounds = array<i64: 8, 8>}, {transform_indices = @transform_1, window_bounds = array<i64: 32, 128>}, {transform_indices = @transform_2, window_bounds = array<i64: 8, 128>}]} {
    %c0_i32 = arith.constant 0 : i32
    %0 = arith.cmpi eq, %arg1, %c0_i32 : i32
    %1 = arith.extui %0 : i1 to i32
    %c0_i32_0 = arith.constant 0 : i32
    %2 = arith.cmpi ne, %1, %c0_i32_0 : i32
    scf.if %2 {
      %cst_7 = arith.constant 0.000000e+00 : f32
      %22 = vector.broadcast %cst_7 : f32 to vector<8x128xf32>
      %c0_8 = arith.constant 0 : index
      %c0_9 = arith.constant 0 : index
      %23 = vector.load %arg5[%c0_8, %c0_9] : memref<8x128xf32, #tpu.memory_space<vmem>>, vector<8x128xf32>
      tpu.vector_store %arg5[%c0_8, %c0_9], %22 {strides = array<i32>} : memref<8x128xf32, #tpu.memory_space<vmem>>, vector<8x128xf32>,
    } else {
    }
    %c0 = arith.constant 0 : index
    %c0_1 = arith.constant 0 : index
    %3 = vector.load %arg2[%c0, %c0_1] : memref<8x8xi32, #tpu.memory_space<vmem>>, vector<8x8xi32>
    %c32_i32 = arith.constant 32 : i32
    %4 = arith.muli %arg1, %c32_i32 : i32
    %5 = vector.broadcast %4 : i32 to vector<8x8xi32>
    %6 = arith.cmpi sge, %3, %5 : vector<8x8xi32>
    %c32_i32_2 = arith.constant 32 : i32
    %7 = arith.addi %4, %c32_i32_2 : i32
    %8 = vector.broadcast %7 : i32 to vector<8x8xi32>
    %9 = arith.cmpi slt, %3, %8 : vector<8x8xi32>
    %10 = arith.andi %6, %9 : vector<8x8xi1>
    %11 = arith.extui %10 : vector<8x8xi1> to vector<8x8xi32>
    %12 = vector.shape_cast %11 : vector<8x8xi32> to vector<1x8x8xi32>
    %cst = arith.constant dense<-2147483648> : vector<1xi32>
    %13 = vector.multi_reduction <maxsi>, %12, %cst [1, 2] : vector<1x8x8xi32> to vector<1xi32>
    %14 = vector.shape_cast %13 : vector<1xi32> to vector<1x1x1xi32>
    %15 = vector.extract %14[0, 0, 0] : i32 from vector<1x1x1xi32>
    %c0_i32_3 = arith.constant 0 : i32
    %16 = arith.cmpi sgt, %15, %c0_i32_3 : i32
    %17 = arith.extui %16 : i1 to i32
    %c0_i32_4 = arith.constant 0 : i32
    %18 = arith.cmpi ne, %17, %c0_i32_4 : i32
    scf.if %18 {
      %22 = tpu.iota {dimensions = array<i32: 2>} : vector<1x1x32xi32>
      %23 = vector.broadcast %4 : i32 to vector<1x1x32xi32>
      %24 = arith.addi %23, %22 : vector<1x1x32xi32>
      %c0_i32_7 = arith.constant 0 : i32
      %25 = vector.broadcast %c0_i32_7 : i32 to vector<8x32xi32>
      %26 = vector.shape_cast %3 : vector<8x8xi32> to vector<8x8x1xi32>
      %27 = vector.broadcast %26 : vector<8x8x1xi32> to vector<8x8x32xi32>
      %28 = vector.broadcast %24 : vector<1x1x32xi32> to vector<8x8x32xi32>
      %29 = arith.cmpi eq, %27, %28 : vector<8x8x32xi32>
      %30 = arith.extui %29 : vector<8x8x32xi1> to vector<8x8x32xi32>
      %cst_8 = arith.constant dense<0> : vector<8x32xi32>
      %31 = vector.multi_reduction <add>, %30, %cst_8 [1] : vector<8x8x32xi32> to vector<8x32xi32>
      %32 = arith.addi %25, %31 : vector<8x32xi32>
      %c0_9 = arith.constant 0 : index
      %c0_10 = arith.constant 0 : index
      %33 = vector.load %arg3[%c0_9, %c0_10] : memref<32x128xf32, #tpu.memory_space<vmem>>, vector<32x128xf32>
      %c0_11 = arith.constant 0 : index
      %c0_12 = arith.constant 0 : index
      %34 = vector.load %arg5[%c0_11, %c0_12] : memref<8x128xf32, #tpu.memory_space<vmem>>, vector<8x128xf32>
      %35 = arith.sitofp %32 : vector<8x32xi32> to vector<8x32xf32>
      %cst_13 = arith.constant dense<0.000000e+00> : vector<8x128xf32>
      %36 = tpu.matmul %35, %33, %cst_13 {dimension_numbers = #tpu.dot_dimension_numbers<[1], [0], [0], [1], [0, 0, 1, 1], [], []>} : vector<8x32xf32>, vector<32x128xf32>, vector<8x128xf32> -> vector<8x128xf32>
      %37 = arith.addf %34, %36 : vector<8x128xf32>
      %c0_14 = arith.constant 0 : index
      %c0_15 = arith.constant 0 : index
      %38 = vector.load %arg5[%c0_14, %c0_15] : memref<8x128xf32, #tpu.memory_space<vmem>>, vector<8x128xf32>
      tpu.vector_store %arg5[%c0_14, %c0_15], %37 {strides = array<i32>} : memref<8x128xf32, #tpu.memory_space<vmem>>, vector<8x128xf32>,
    } else {
    }
    %c0_i32_5 = arith.constant 0 : i32
    %19 = arith.cmpi eq, %arg1, %c0_i32_5 : i32
    %20 = arith.extui %19 : i1 to i32
    %c0_i32_6 = arith.constant 0 : i32
    %21 = arith.cmpi ne, %20, %c0_i32_6 : i32
    scf.if %21 {
      %c0_7 = arith.constant 0 : index
      %c0_8 = arith.constant 0 : index
      %22 = vector.load %arg5[%c0_7, %c0_8] : memref<8x128xf32, #tpu.memory_space<vmem>>, vector<8x128xf32>
      %cst_9 = arith.constant 1.250000e-01 : f32
      %23 = vector.broadcast %cst_9 : f32 to vector<8x128xf32>
      %24 = arith.mulf %22, %23 : vector<8x128xf32>
      %c0_10 = arith.constant 0 : index
      %c0_11 = arith.constant 0 : index
      %25 = vector.load %arg4[%c0_10, %c0_11] : memref<8x128xf32, #tpu.memory_space<vmem>>, vector<8x128xf32>
      tpu.vector_store %arg4[%c0_10, %c0_11], %24 {strides = array<i32>} : memref<8x128xf32, #tpu.memory_space<vmem>>, vector<8x128xf32>,
    } else {
    }
    return
  }
  func.func @transform_0(%arg0: i32, %arg1: i32) -> (i32, i32) {
    %c0_i32 = arith.constant 0 : i32
    %c0_i32_0 = arith.constant 0 : i32
    return %arg0, %c0_i32 : i32, i32
  }
  func.func @transform_1(%arg0: i32, %arg1: i32) -> (i32, i32) {
    %c0_i32 = arith.constant 0 : i32
    %c0_i32_0 = arith.constant 0 : i32
    return %arg1, %c0_i32 : i32, i32
  }
  func.func @transform_2(%arg0: i32, %arg1: i32) -> (i32, i32) {
    %c0_i32 = arith.constant 0 : i32
    %c0_i32_0 = arith.constant 0 : i32
    return %arg0, %c0_i32 : i32, i32
  }
}

</mosaic_0001>

<bundles_post_ra>
// kernel: tpu_custom_call.1
= control target key start
LH: loop header
LB: loop body
LE: loop exit
PB: predicated region body
PF: predicated region fallthrough
CT: control target
= control target key end

     0   :  { %7 = vsyncpa [#allocation4], 0  ;;  %s532_s0 = inlined_call_operand.hbm [shape: s32[8,8], index: 0, kind: input, shape index: {}]   ;;  %s533_s1 = inlined_call_operand.hbm [shape: f32[32,128], index: 1, kind: input, shape index: {}]   ;;  %s534_s2 = inlined_call_operand.hbm [shape: f32[8,128], index: 2, kind: output, shape index: {}]  }
   0x1   :  { %8 = vsyncpa [#allocation7], 0 }
   0x2   :  { %9 = vsyncpa [#allocation5], 0  ;;  %s454_s9 = smov [#allocation3]   ;;  %s455_s11 = smov [#allocation6]  }
   0x3   :  { %s16_s10 = sshll.u32 %s454_s9, 4  ;;  %s25_s12 = sshll.u32 %s455_s11, 4  ;;  %s17_s10 = int_to_ptr.vmem [resolvable:$true] %s16_s10  ;;  %s480_s12 = int_to_ptr.vmem [resolvable:$true] %s25_s12 }
   0x4   :  { %s382_s15 = scalar_lea.hbm %s532_s0, 128 }
   0x5   :  { %p383_p0 = scmp.ne.s32.totalorder %s532_s0, %s382_s15  ;;  %p386_p1 = scmp.lt.u32.totalorder %s382_s15, %s532_s0 }
   0x7   :  { %p388_p2 = pnand %p386_p1, %p383_p0 }
   0x9   :  { %391 = shalt.err (!%p388_p2)
}
   0xa   :  { %s392_s20 = scalar_lea.vmem %s17_s10, 128  ;;  %p397_p4 = scmp.lt.s32.totalorder %s17_s10, %s17_s10 }
   0xb   :  { %p393_p3 = scmp.ne.s32.totalorder %s17_s10, %s392_s20  ;;  %p398_p5 = scmp.lt.s32.totalorder %s392_s20, %s392_s20 }
   0xd   :  { %p399_p6 = por %p398_p5, %p397_p4 }
   0xf   :  { %p400_p7 = pnand %p399_p6, %p393_p3 }
  0x11   :  { %403 = shalt.err (!%p400_p7)
}
  0x12   :  { %19 = dma.hbm_to_vmem [thread:$0]  %s532_s0, 128, %s17_s10, [#allocation4]  }
  0x13   :  { %s404_s25 = scalar_lea.hbm %s533_s1, 512 }
  0x14   :  { %p405_p8 = scmp.ne.s32.totalorder %s533_s1, %s404_s25  ;;  %p408_p9 = scmp.lt.u32.totalorder %s404_s25, %s533_s1 }
  0x16   :  { %p410_p10 = pnand %p408_p9, %p405_p8 }
  0x18   :  { %413 = shalt.err (!%p410_p10)
}
  0x19   :  { %s414_s30 = scalar_lea.vmem %s480_s12, 512  ;;  %p419_p12 = scmp.lt.s32.totalorder %s480_s12, %s480_s12 }
  0x1a   :  { %p415_p11 = scmp.ne.s32.totalorder %s480_s12, %s414_s30  ;;  %p420_p13 = scmp.lt.s32.totalorder %s414_s30, %s414_s30 }
  0x1c   :  { %p421_p0 = por %p420_p13, %p419_p12 }
  0x1e   :  { %p422_p1 = pnand %p421_p0, %p415_p11 }
  0x20   :  { %425 = shalt.err (!%p422_p1)
}
  0x21   :  { %s456_s0 = smov 128   ;;  %s457_s3 = smov 8  }
  0x22   :  { %31 = dma.hbm_to_vmem [thread:$0]  %s533_s1, 512, %s480_s12, [#allocation7], %s456_s0, %s456_s0, %s457_s3  }
  0x23   :  { %448 = dma.done.wait [#allocation4], 128  }
  0x24   :  { %449 = vsyncadd [#allocation4], 4294967168 }
  0x25   :  { %450 = dma.done.wait [#allocation7], 512  }
  0x26   :  { %451 = vsyncadd [#allocation7], 4294966784  ;;  %v458_v0 = vmov 0.0   ;;  %v43_v1 = vld [vmem:[#allocation3] sm:$0xff]  ;;  %vm52_vm2 = vcmask 64512   ;;  %v459_v2 = vmov 0  }
  0x27   :  { %42 = vst [vmem:[#allocation2] sm:$0xff] %v458_v0  ;;  %vm46_vm0 = vcmp.ge.s32.totalorder %v43_v1, 0  ;;  %vm49_vm1 = vcmp.lt.s32.totalorder %v43_v1, 32 }
  0x28   :  { %vm50_vm3 = vmand %vm46_vm0, %vm49_vm1 }
  0x29   :  { %v51_v3 = vsel %vm50_vm3, 1, %v459_v2 }
  0x2a   :  { %v53_v4 = vsel %vm52_vm2, %v51_v3, 2147483648 }
  0x2b   :  { %v55_v5 = vshra.s32 %v53_v4, 16  ;;  %v54_v7 = vand.u32 65535, %v53_v4 }
  0x2d   :  { %v57_v6 = vcvt.s32.f32 %v55_v5  ;;  %v56_v8 = vcvt.s32.f32 %v54_v7 }
  0x2f   :  { %58 = vmax.xlane.f32.xlu0 %v57_v6 }
  0xbc   :  { %v59_v9 = vpop.xlane.xlu0 %58 }
  0xbd   :  { %vm60_vm4 = vcmp.eq.f32.partialorder %v57_v6, %v59_v9  ;;  %v65_v11 = vcvt.f32.s32 %v59_v9 }
  0xbe   :  { %v61_v10 = vsel %vm60_vm4, %v56_v8, -inf }
  0xbf   :  { %62 = vmax.xlane.f32.xlu0 %v61_v10  ;;  %v66_v13 = vshll.u32 %v65_v11, 16 }
 0x14c   :  { %v63_v12 = vpop.xlane.xlu0 %62 }
 0x14d   :  { %v64_v14 = vcvt.f32.s32 %v63_v12 }
 0x14f   :  { %v67_v15 = vadd.s32 %v66_v13, %v64_v14 }
 0x151   :  { %v68_v16 = vrot.slane %v67_v15, 4 }
 0x153   :  { %vm69_vm5 = vcmp.gt.s32.totalorder %v67_v15, %v68_v16 }
 0x154   :  { %v70_v17 = vsel %vm69_vm5, %v67_v15, %v68_v16 }
 0x155   :  { %v71_v18 = vrot.slane %v70_v17, 2 }
 0x157   :  { %vm72_vm6 = vcmp.gt.s32.totalorder %v70_v17, %v71_v18 }
 0x158   :  { %v73_v19 = vsel %vm72_vm6, %v70_v17, %v71_v18 }
 0x159   :  { %v74_v20 = vrot.slane %v73_v19, 1 }
 0x15b   :  { %vm75_vm7 = vcmp.gt.s32.totalorder %v73_v19, %v74_v20 }
 0x15c   :  { %v76_v21 = vsel %vm75_vm7, %v73_v19, %v74_v20 }
 0x15d   :  { %369 = vpush %v76_v21 }
 0x18e   :  { %s370_s1 = spop %369 }
 0x18f   :  { %p345_p2 = scmp.le.s32.totalorder %s370_s1, 0 }
 0x190   :  { %v82_v22 = vlaneseq (!%p345_p2)  ;;  %v214_v40 = vld [vmem:[#allocation6] sm:$0xff] (!%p345_p2)  ;;  %v215_v41 = vld [vmem:[#allocation6 + $0x8] sm:$0xff] (!%p345_p2)  ;;  %v460_v43 = vmov (!%p345_p2), 0.0|0.0   ;;  %v216_v44 = vld [vmem:[#allocation6 + $0x10] sm:$0xff] (!%p345_p2)  ;;  %vm461_vm8 = vmmov (!%p345_p2), 0   ;;  %v462_v47 = vmov (!%p345_p2), 0.0  }
 0x191   :  { %81 = sbr.rel (%p345_p2) target bundleno = 771 (0x303), region = 25  ;;  %v364_v42 = vpack.c.bf16 (!%p345_p2), %v215_v41, %v214_v40  ;;  %363 = vmatprep.subr.bf16.mxu0 (!%p345_p2), %v460_v43  ;;  %v217_v45 = vld [vmem:[#allocation6 + $0x18] sm:$0xff] (!%p345_p2)  ;;  %360 = vmatprep.mubr.msk.f32.mxu0 (!%p345_p2), %vm461_vm8, %v462_v47  ;;  %vm157_vm9 = vcmask (!%p345_p2), 261120   ;;  %v463_v51 = vmov (!%p345_p2), 0   ;;  %vm235_vm2 = vcmask (!%p345_p2), 1041409  }
 0x192   :  { %v86_v23 = vshrl.u32 (!%p345_p2), %v82_v22, 7  ;;  %v367_v46 = vpack.c.bf16 (!%p345_p2), %v217_v45, %v216_v44  ;;  %v83_v48 = vand.u32 (!%p345_p2), 127, %v82_v22  ;;  %vm237_vm3 = vcmask (!%p345_p2), 1042434  }
 0x193   :  { %365 = vmatpush3.bf16.msra.mxu0 (!%p345_p2), %v364_v42  ;;  %vm239_vm4 = vcmask (!%p345_p2), 1043459   ;;  %vm241_vm5 = vcmask (!%p345_p2), 1044484   ;;  %vm243_vm6 = vcmask (!%p345_p2), 1045509   ;;  %vm245_vm7 = vcmask (!%p345_p2), 1046534  }
 0x194   :  { %v101_v24 = vsub.s32 (!%p345_p2), 2, %v86_v23  ;;  %v87_v25 = vsub.s32 (!%p345_p2), 0, %v86_v23  ;;  %v108_v26 = vsub.s32 (!%p345_p2), 3, %v86_v23  ;;  %v94_v27 = vsub.s32 (!%p345_p2), 1, %v86_v23  ;;  %366 = vmatprep.subr.bf16.mxu0 (!%p345_p2), %v460_v43 }
 0x195   :  { %v122_v32 = vsub.s32 (!%p345_p2), 5, %v86_v23  ;;  %v115_v33 = vsub.s32 (!%p345_p2), 4, %v86_v23  ;;  %v136_v36 = vsub.s32 (!%p345_p2), 7, %v86_v23  ;;  %v129_v37 = vsub.s32 (!%p345_p2), 6, %v86_v23 }
 0x196   :  { %v102_v28 = vrot.slane (!%p345_p2), %v43_v1, %v101_v24  ;;  %v88_v29 = vrot.slane (!%p345_p2), %v43_v1, %v87_v25  ;;  %v109_v30 = vrot.slane (!%p345_p2), %v43_v1, %v108_v26  ;;  %v95_v31 = vrot.slane (!%p345_p2), %v43_v1, %v94_v27 }
 0x197   :  { %v123_v34 = vrot.slane (!%p345_p2), %v43_v1, %v122_v32  ;;  %v116_v35 = vrot.slane (!%p345_p2), %v43_v1, %v115_v33  ;;  %v137_v38 = vrot.slane (!%p345_p2), %v43_v1, %v136_v36  ;;  %v130_v39 = vrot.slane (!%p345_p2), %v43_v1, %v129_v37  ;;  %368 = vmatpush3.bf16.msra.mxu0 (!%p345_p2), %v367_v46 }
 0x198   :  { %104 = vbcast.lane.b32.xlu1 %v102_v28, 256  ;;  %90 = vbcast.lane.b32.xlu0 %v88_v29, 256  ;;  %vm247_vm8 = vcmask 1047559  }
 0x19c   :  { %111 = vbcast.lane.b32.xlu1 %v109_v30, 256  ;;  %97 = vbcast.lane.b32.xlu0 %v95_v31, 256 }
 0x1a0   :  { %125 = vbcast.lane.b32.xlu1 %v123_v34, 256  ;;  %118 = vbcast.lane.b32.xlu0 %v116_v35, 256 }
 0x1a4   :  { %139 = vbcast.lane.b32.xlu1 %v137_v38, 256  ;;  %132 = vbcast.lane.b32.xlu0 %v130_v39, 256 }
 0x20a   :  { %v105_v49 = vpop.permute.xlu1 %104  ;;  %v91_v50 = vpop.permute.xlu0 %90 }
 0x20b   :  { %vm143_vm10 = vcmp.eq.s32.totalorder %v105_v49, %v83_v48  ;;  %vm141_vm11 = vcmp.eq.s32.totalorder %v91_v50, %v83_v48 }
 0x20c   :  { %v151_v52 = vsel %vm143_vm10, 1, %v463_v51  ;;  %v149_v53 = vsel %vm141_vm11, 1, %v463_v51 }
 0x20d   :  { %v172_v54 = vsel %vm157_vm9, %v151_v52, 0  ;;  %v158_v55 = vsel %vm157_vm9, %v149_v53, 0 }
 0x20e   :  { %v173_v56 = vrot.slane %v172_v54, 4  ;;  %v159_v57 = vrot.slane %v158_v55, 4  ;;  %v112_v58 = vpop.permute.xlu1 %111  ;;  %v98_v59 = vpop.permute.xlu0 %97 }
 0x20f   :  { %vm144_vm12 = vcmp.eq.s32.totalorder %v112_v58, %v83_v48  ;;  %vm142_vm13 = vcmp.eq.s32.totalorder %v98_v59, %v83_v48 }
 0x210   :  { %v174_v60 = vadd.s32 %v173_v56, %v172_v54  ;;  %v160_v61 = vadd.s32 %v159_v57, %v158_v55  ;;  %v152_v62 = vsel %vm144_vm12, 1, %v463_v51  ;;  %v150_v63 = vsel %vm142_vm13, 1, %v463_v51 }
 0x211   :  { %v179_v0 = vsel %vm157_vm9, %v152_v62, 0  ;;  %v165_v1 = vsel %vm157_vm9, %v150_v63, 0 }
 0x212   :  { %v175_v2 = vrot.slane %v174_v60, 2  ;;  %v161_v3 = vrot.slane %v160_v61, 2  ;;  %v180_v4 = vrot.slane %v179_v0, 4  ;;  %v166_v5 = vrot.slane %v165_v1, 4  ;;  %v126_v6 = vpop.permute.xlu1 %125  ;;  %v119_v7 = vpop.permute.xlu0 %118 }
 0x213   :  { %vm146_vm14 = vcmp.eq.s32.totalorder %v126_v6, %v83_v48  ;;  %vm145_vm15 = vcmp.eq.s32.totalorder %v119_v7, %v83_v48 }
 0x214   :  { %v176_v8 = vadd.s32 %v175_v2, %v174_v60  ;;  %v162_v9 = vadd.s32 %v161_v3, %v160_v61  ;;  %v181_v10 = vadd.s32 %v180_v4, %v179_v0  ;;  %v167_v11 = vadd.s32 %v166_v5, %v165_v1 }
 0x215   :  { %v154_v12 = vsel %vm146_vm14, 1, %v463_v51  ;;  %v153_v13 = vsel %vm145_vm15, 1, %v463_v51 }
 0x216   :  { %v177_v14 = vrot.slane %v176_v8, 1  ;;  %v163_v15 = vrot.slane %v162_v9, 1  ;;  %v182_v16 = vrot.slane %v181_v10, 2  ;;  %v168_v17 = vrot.slane %v167_v11, 2  ;;  %v140_v18 = vpop.permute.xlu1 %139  ;;  %v133_v19 = vpop.permute.xlu0 %132 }
 0x217   :  { %v193_v20 = vsel %vm157_vm9, %v154_v12, 0  ;;  %v186_v21 = vsel %vm157_vm9, %v153_v13, 0  ;;  %vm148_vm0 = vcmp.eq.s32.totalorder %v140_v18, %v83_v48  ;;  %vm147_vm1 = vcmp.eq.s32.totalorder %v133_v19, %v83_v48 }
 0x218   :  { %v164_v22 = vadd.s32 %v163_v15, %v162_v9  ;;  %v183_v23 = vadd.s32 %v182_v16, %v181_v10  ;;  %v169_v24 = vadd.s32 %v168_v17, %v167_v11  ;;  %v194_v25 = vrot.slane %v193_v20, 4  ;;  %v218_v9 = vld [vmem:[#allocation2] sm:$0xff] }
 0x219   :  { %v187_v26 = vrot.slane %v186_v21, 4  ;;  %v156_v27 = vsel %vm148_vm0, 1, %v463_v51  ;;  %v155_v28 = vsel %vm147_vm1, 1, %v463_v51  ;;  %v178_v29 = vadd.s32 %v177_v14, %v176_v8 }
 0x21a   :  { %v184_v30 = vrot.slane %v183_v23, 1  ;;  %v170_v31 = vrot.slane %v169_v24, 1  ;;  %v195_v32 = vadd.s32 %v194_v25, %v193_v20  ;;  %v207_v34 = vsel %vm157_vm9, %v156_v27, 0 }
 0x21b   :  { %v188_v33 = vadd.s32 %v187_v26, %v186_v21  ;;  %v200_v35 = vsel %vm157_vm9, %v155_v28, 0  ;;  %v208_v37 = vrot.slane %v207_v34, 4  ;;  %v219_v39 = vcvt.s32.f32 %v164_v22 }
 0x21c   :  { %v171_v36 = vadd.s32 %v170_v31, %v169_v24  ;;  %v201_v38 = vrot.slane %v200_v35, 4  ;;  %v196_v40 = vrot.slane %v195_v32, 2  ;;  %v185_v42 = vadd.s32 %v184_v30, %v183_v23 }
 0x21d   :  { %v189_v41 = vrot.slane %v188_v33, 2  ;;  %v209_v44 = vadd.s32 %v208_v37, %v207_v34  ;;  %v221_v46 = vcvt.s32.f32 %v178_v29 }
 0x21e   :  { %v220_v43 = vcvt.s32.f32 %v171_v36  ;;  %v202_v45 = vadd.s32 %v201_v38, %v200_v35  ;;  %v197_v47 = vadd.s32 %v196_v40, %v195_v32  ;;  %v222_v55 = vcvt.s32.f32 %v185_v42 }
 0x21f   :  { %v190_v48 = vadd.s32 %v189_v41, %v188_v33  ;;  %v210_v50 = vrot.slane %v209_v44, 2 }
 0x220   :  { %v236_v49 = vsel %vm235_vm2, %v220_v43, %v219_v39  ;;  %v203_v51 = vrot.slane %v202_v45, 2  ;;  %v198_v52 = vrot.slane %v197_v47, 1 }
 0x221   :  { %v191_v53 = vrot.slane %v190_v48, 1  ;;  %v238_v54 = vsel %vm237_vm3, %v221_v46, %v236_v49  ;;  %v211_v56 = vadd.s32 %v210_v50, %v209_v44 }
 0x222   :  { %v204_v57 = vadd.s32 %v203_v51, %v202_v45  ;;  %v199_v58 = vadd.s32 %v198_v52, %v197_v47  ;;  %v240_v62 = vsel %vm239_vm4, %v222_v55, %v238_v54 }
 0x223   :  { %v192_v59 = vadd.s32 %v191_v53, %v190_v48  ;;  %v212_v60 = vrot.slane %v211_v56, 1 }
 0x224   :  { %v205_v61 = vrot.slane %v204_v57, 1  ;;  %v224_v63 = vcvt.s32.f32 %v199_v58 }
 0x225   :  { %v223_v0 = vcvt.s32.f32 %v192_v59  ;;  %v213_v1 = vadd.s32 %v212_v60, %v211_v56 }
 0x226   :  { %v206_v2 = vadd.s32 %v205_v61, %v204_v57 }
 0x227   :  { %v242_v3 = vsel %vm241_vm5, %v223_v0, %v240_v62  ;;  %v226_v5 = vcvt.s32.f32 %v213_v1 }
 0x228   :  { %v225_v4 = vcvt.s32.f32 %v206_v2  ;;  %v244_v6 = vsel %vm243_vm6, %v224_v63, %v242_v3 }
 0x22a   :  { %v246_v7 = vsel %vm245_vm7, %v225_v4, %v244_v6 }
 0x22b   :  { %v248_v8 = vsel %vm247_vm8, %v226_v5, %v246_v7 }
 0x22c   :  { %361 = vmatmul.mubr.msk.f32.vlgmr.msra.gmra.mrb[0].mxu0 %vm157_vm9, %v248_v8 }
 0x2ff   :  { %v317_v10 = vpop.f32.mrb[0].mxu0 }
 0x300   :  { %v321_v11 = vadd.f32 %v317_v10, %v218_v9  ;;  %v362_v12 = vpop.f32.mrb[1].mxu0 }
 0x302   :  { %322 = vst [vmem:[#allocation2] sm:$0xff] %v321_v11 }
 0x303 PF:  { %s464_s6 = smov [#allocation8]  }
 0x304   :  { %s335_s7 = sshll.u32 %s464_s6, 4  ;;  %s336_s7 = int_to_ptr.vmem [resolvable:$true] %s335_s7 }
 0x305   :  { %s426_s8 = scalar_lea.vmem %s336_s7, 128  ;;  %p431_p4 = scmp.lt.s32.totalorder %s336_s7, %s336_s7 }
 0x306   :  { %p427_p3 = scmp.ne.s32.totalorder %s336_s7, %s426_s8  ;;  %p432_p5 = scmp.lt.s32.totalorder %s426_s8, %s426_s8 }
 0x308   :  { %p433_p6 = por %p432_p5, %p431_p4 }
 0x309   :  { %v326_v13 = vld [vmem:[#allocation2] sm:$0xff] }
 0x30a   :  { %v327_v14 = vmul.f32 0.125, %v326_v13  ;;  %p434_p7 = pnand %p433_p6, %p427_p3 }
 0x30c   :  { %328 = vst [vmem:[#allocation8] sm:$0xff] %v327_v14 }
 0x30d   :  { %437 = shalt.err (!%p434_p7)
}
 0x30e   :  { %s438_s11 = scalar_lea.hbm %s534_s2, 128 }
 0x30f   :  { %p439_p8 = scmp.ne.s32.totalorder %s534_s2, %s438_s11  ;;  %p442_p9 = scmp.lt.u32.totalorder %s438_s11, %s534_s2 }
 0x311   :  { %p444_p10 = pnand %p442_p9, %p439_p8 }
 0x313   :  { %447 = shalt.err (!%p444_p10)
}
 0x314   :  { %338 = dma.vmem_to_hbm [thread:$0]  %s336_s7, 128, %s534_s2, [#allocation5]  }
 0x315   :  { %452 = dma.done.wait [#allocation5], 128  }
 0x316   :  { %453 = vsyncadd [#allocation5], 4294967168 }
 0x317   :  { %342 = vsyncpa [#allocation4], 1 }
 0x318   :  { %343 = vsyncpa [#allocation7], 1 }
 0x319   :  { %344 = vsyncpa [#allocation5], 1 }

</bundles_post_ra>
